<compile_context>
chip_gen: v7x
topology: tpu7x:2x2x1
jax: 0.10.0
libtpu: 0.0.40
codegen_flags: <defaults>
</compile_context>

<pallas_src>
import jax
import jax.numpy as jnp
from jax.experimental import pallas as pl
from jax.experimental.pallas import tpu as pltpu


# --------------------------------------------------------------- constants

_XLA_BYPASS_BYTES = 256 * 1024          # tiny tensors: pallas_call fixed cost dominates
_HARD_TILE_CAP_BYTES = 8 * 1024 * 1024  # never emit a tile bigger than this
_MIN_GRID_STEPS = 8                     # feed both v7x TCs + give the pipeline slack


# ------------------------------------------------------------------ helpers

def _sublane_pack(dtype) -> int:
    """Sublane packing factor: 8 for f32, 16 for bf16, 32 for int8/fp8."""
    itemsize = jnp.dtype(dtype).itemsize
    return max(8, 32 // itemsize)


def _vmem_budget_and_limit():
    """(per-buffer tile budget, scoped VMEM limit) in bytes, per generation.

    v5e/v6e have 128 MiB physical VMEM -> 4 MiB tiles, 64 MiB scoped limit.
    v7x has only 64 MiB per TensorCore  -> 2 MiB tiles, 40 MiB scoped limit.
    """
    try:
        vmem = int(pltpu.get_tpu_info().vmem_capacity_bytes)
    except Exception:
        vmem = 64 * 1024 * 1024  # conservative default (v7x-sized)
    if vmem >= 96 * 1024 * 1024:
        return 4 * 1024 * 1024, 64 * 1024 * 1024
    return 2 * 1024 * 1024, 40 * 1024 * 1024


def _pick_tile_h(n, c, h, w, dtype, budget):
    """Tile height for the NCHW->NHWC fast path.

    Candidates keep both BlockSpec minor dims legal ((tH*W) % 128 == 0 for the
    flattened input block, tH % 8 == 0 for the output block, or full extent),
    fit the per-buffer budget, and leave at least _MIN_GRID_STEPS grid steps.
    """
    pack = _sublane_pack(dtype)
    itemsize = jnp.dtype(dtype).itemsize
    cands = [t for t in range(pack, h, pack)
             if h % t == 0 and (t * w) % 128 == 0]
    cands.append(h)  # full extent is always a legal block
    fitting = [t for t in cands if c * t * w * itemsize <= budget]
    if not fitting:
        return min(cands)  # best effort; caller enforces the hard cap
    enough = [t for t in fitting if n * (h // t) >= _MIN_GRID_STEPS]
    # Largest tile that still gives enough steps; otherwise maximize step count
    # (per-step overhead ~0.35 us, so trading tile size for steps is cheap).
    return max(enough) if enough else min(fitting)


def _pick_tile_2d(s, l, pack, itemsize, budget):
    """(sublane tile, lane tile) for the DMA-only generic path."""
    lane_cands = [t for t in range(128, l, 128) if l % t == 0] + [l]
    sub_cands = [t for t in range(pack, s, pack) if s % t == 0] + [s]
    best = None
    for tl in lane_cands:
        for ts in sub_cands:
            if ts * tl * itemsize <= budget:
                score = (ts * tl, tl)  # biggest tile, lane-dense preferred
                if best is None or score > best[0]:
                    best = (score, (ts, tl))
    if best is not None:
        return best[1]
    return min(sub_cands), min(lane_cands)


# ------------------------------------------------- fast path: NCHW -> NHWC

def _make_nchw_to_nhwc_kernel(c, th, w):
    def kernel(x_ref, o_ref):
        # x_ref block: (1, C, tH*W) -- lane-dense load.  Un-flatten only for
        # the relayout, then store a lane-dense (1, tH, W*C) slab so the vst
        # rows are full-width instead of masked C-wide stores.
        # TODO(synk): collapse into a single pltpu.einshape("nc(hw)->nh(wc)")
        # relayout once the grouped-axes syntax is verified; transpose+reshape
        # is the known-good spelling.
        x = x_ref[...].reshape(1, c, th, w)
        y = jnp.transpose(x, (0, 2, 3, 1))        # (1, tH, W, C)
        o_ref[...] = y.reshape(1, th, w * c)      # lane-dense store
    return kernel


def _nchw_to_nhwc(x, budget, vmem_limit):
    n, c, h, w = x.shape
    itemsize = jnp.dtype(x.dtype).itemsize
    th = _pick_tile_h(n, c, h, w, x.dtype, budget)
    if c * th * w * itemsize > _HARD_TILE_CAP_BYTES:
        # Even the smallest legal tile would blow scoped VMEM.
        # TODO(synk): add a W-tiled variant for extremely wide feature maps.
        return jnp.transpose(x, (0, 2, 3, 1))

    x_flat = x.reshape(n, c, h * w)               # contiguous reshape -> free
    grid = (n, h // th)

    out_flat = pl.pallas_call(
        _make_nchw_to_nhwc_kernel(c, th, w),
        out_shape=jax.ShapeDtypeStruct((n, h, w * c), x.dtype),
        grid_spec=pltpu.PrefetchScalarGridSpec(
            num_scalar_prefetch=0,
            grid=grid,
            in_specs=[pl.BlockSpec((1, c, th * w), lambda i, j: (i, 0, j))],
            out_specs=pl.BlockSpec((1, th, w * c), lambda i, j: (i, j, 0)),
        ),
        compiler_params=pltpu.CompilerParams(
            dimension_semantics=("parallel", "parallel"),
            vmem_limit_bytes=vmem_limit),
    )(x_flat)

    # Contiguous reshape back to NHWC: free (pure metadata).
    return out_flat.reshape(n, h, w, c)


# ------------------------------- generic path: leading-axes-only permutation

def _copy_kernel(x_ref, o_ref):
    o_ref[...] = x_ref[...]                       # pure HBM-BW-bound copy


def _permute_lead_axes(x, permute, budget, vmem_limit):
    """Permutations that keep the last two axes as the last two output axes:
    express the permutation entirely in the index maps and make the kernel a
    straight copy -> DMA-only, no in-kernel relayout, bounded VMEM."""
    nd = x.ndim
    lead = nd - 2
    in_shape = x.shape
    out_shape = tuple(in_shape[p] for p in permute)
    s, l = in_shape[-2], in_shape[-1]
    itemsize = jnp.dtype(x.dtype).itemsize
    pack = _sublane_pack(x.dtype)

    ts, tl = _pick_tile_2d(s, l, pack, itemsize, budget)
    if ts * tl * itemsize > _HARD_TILE_CAP_BYTES:
        # TODO(synk): minor dims with no VMEM-sized aligned divisor.
        return jnp.transpose(x, permute)

    inv = tuple(permute.index(d) for d in range(nd))  # out axis carrying in axis d
    grid = tuple(out_shape[:lead]) + (s // ts, l // tl)
    in_block = (1,) * lead + (ts, tl)
    out_block = (1,) * lead + (ts, tl)

    def in_index_map(*idx):
        lead_idx = idx[:lead]
        return tuple(lead_idx[inv[d]] for d in range(lead)) + (idx[lead], idx[lead + 1])

    def out_index_map(*idx):
        return idx

    return pl.pallas_call(
        _copy_kernel,
        out_shape=jax.ShapeDtypeStruct(out_shape, x.dtype),
        grid_spec=pltpu.PrefetchScalarGridSpec(
            num_scalar_prefetch=0,
            grid=grid,
            in_specs=[pl.BlockSpec(in_block, in_index_map)],
            out_specs=pl.BlockSpec(out_block, out_index_map),
        ),
        compiler_params=pltpu.CompilerParams(
            dimension_semantics=("parallel",) * len(grid),
            vmem_limit_bytes=vmem_limit),
    )(x)


# --------------------------------------------------------------- public API

def pallas_permute(state, permute, *, force_pallas=False):
    """Equivalent of Permute.forward: state.permute(permute).contiguous()."""
    if isinstance(state, tuple):
        state = state[0]
    x = state

    permute = tuple(int(p) for p in permute)
    nd = x.ndim
    assert sorted(permute) == list(range(nd)), "invalid permutation"

    if permute == tuple(range(nd)):
        return x  # identity permute + contiguous is a no-op

    budget, vmem_limit = _vmem_budget_and_limit()
    nbytes = x.size * jnp.dtype(x.dtype).itemsize

    if not force_pallas and nbytes <= _XLA_BYPASS_BYTES:
        # Tiny tensors: pallas_call fixed cost + 1-2 grid steps dominate.
        return jnp.transpose(x, permute)

    if nd == 4 and permute == (0, 2, 3, 1):
        n, c, h, w = x.shape
        if not force_pallas and w * c < 128:
            # Lane-dense store premise fails (masked vst.msk) -> XLA is faster.
            return jnp.transpose(x, permute)
        return _nchw_to_nhwc(x, budget, vmem_limit)

    if nd >= 3 and permute[-2:] == (nd - 2, nd - 1):
        return _permute_lead_axes(x, permute, budget, vmem_limit)

    # TODO(synk): Pallas paths for permutations that move one of the two minor
    # axes (other than NCHW->NHWC); fall back to XLA's native transpose.
    return jnp.transpose(x, permute)


# ----------------------------------------------------------------- self-test

if __name__ == "__main__":
    # netData for the synthetic module: NCHW -> NHWC
    net_data = {"permute": (0, 2, 3, 1)}
    key = jax.random.PRNGKey(0)

    # Module-sized input (NCHW) -- exercises the tuple-input path too.
    x = jax.random.normal(key, (2, 4, 16, 16), dtype=jnp.float32)
    ref = jnp.transpose(x, net_data["permute"])

    # Default dispatch (small tensor -> XLA bypass) must still be exact.
    out = jax.block_until_ready(pallas_permute((x,), net_data["permute"]))
    assert out.shape == ref.shape == (2, 16, 16, 4)
    assert out.dtype == ref.dtype
    assert bool(jnp.all(out == ref))

    # Force the Pallas NCHW->NHWC fast path on the same input.
    out_p = jax.block_until_ready(
        pallas_permute((x,), net_data["permute"], force_pallas=True))
    assert out_p.shape == ref.shape and bool(jnp.all(out_p == ref))

    # Fast path in its intended lane-dense regime (W*C >= 128, >= 8 grid steps).
    x2 = jax.random.normal(jax.random.fold_in(key, 1), (2, 8, 32, 32),
                           dtype=jnp.float32)
    ref2 = jnp.transpose(x2, (0, 2, 3, 1))
    out2 = jax.block_until_ready(
        pallas_permute(x2, (0, 2, 3, 1), force_pallas=True))
    assert out2.shape == ref2.shape and bool(jnp.all(out2 == ref2))

    # Generic DMA-only path: permutation of the leading axes only.
    ref3 = jnp.transpose(x, (1, 0, 2, 3))
    out3 = jax.block_until_ready(
        pallas_permute(x, (1, 0, 2, 3), force_pallas=True))
    assert out3.shape == ref3.shape and bool(jnp.all(out3 == ref3))

    print("KERNEL_OK")
</pallas_src>

<mosaic_0001>
module attributes {stable_mosaic.version = 11 : i64} {
  func.func @kernel(%arg0: i32, %arg1: i32, %arg2: memref<1x4x128xf32, #tpu.memory_space<vmem>>, %arg3: memref<1x8x64xf32, #tpu.memory_space<vmem>>) attributes {dimension_semantics = [#tpu.dimension_semantics<parallel>, #tpu.dimension_semantics<parallel>], iteration_bounds = array<i64: 2, 2>, scalar_prefetch = 0 : i64, scratch_operands = 0 : i64, tpu.core_type = #tpu.core_type<tc>, window_params = [{transform_indices = @transform_0, window_bounds = array<i64: 1, 4, 128>}, {transform_indices = @transform_1, window_bounds = array<i64: 1, 8, 64>}]} {
    %c0 = arith.constant 0 : index
    %c0_0 = arith.constant 0 : index
    %c0_1 = arith.constant 0 : index
    %0 = vector.load %arg2[%c0, %c0_0, %c0_1] : memref<1x4x128xf32, #tpu.memory_space<vmem>>, vector<1x4x128xf32>
    %1 = vector.shape_cast %0 : vector<1x4x128xf32> to vector<1x4x8x16xf32>
    %2 = tpu.transpose %1, [0, 2, 3, 1] : vector<1x4x8x16xf32> -> vector<1x8x16x4xf32>
    %3 = vector.shape_cast %2 : vector<1x8x16x4xf32> to vector<1x8x64xf32>
    %c0_2 = arith.constant 0 : index
    %c0_3 = arith.constant 0 : index
    %c0_4 = arith.constant 0 : index
    %4 = vector.load %arg3[%c0_2, %c0_3, %c0_4] : memref<1x8x64xf32, #tpu.memory_space<vmem>>, vector<1x8x64xf32>
    tpu.vector_store %arg3[%c0_2, %c0_3, %c0_4], %3 {strides = array<i32>} : memref<1x8x64xf32, #tpu.memory_space<vmem>>, vector<1x8x64xf32>,
    return
  }
  func.func @transform_0(%arg0: i32, %arg1: i32) -> (i32, i32, i32) {
    %c0_i32 = arith.constant 0 : i32
    %c0_i32_0 = arith.constant 0 : i32
    return %arg0, %c0_i32, %arg1 : i32, i32, i32
  }
  func.func @transform_1(%arg0: i32, %arg1: i32) -> (i32, i32, i32) {
    %c0_i32 = arith.constant 0 : i32
    %c0_i32_0 = arith.constant 0 : i32
    return %arg0, %arg1, %c0_i32 : i32, i32, i32
  }
}

</mosaic_0001>

<bundles_post_ra>
// kernel: tpu_custom_call.1
= control target key start
LH: loop header
LB: loop body
LE: loop exit
PB: predicated region body
PF: predicated region fallthrough
CT: control target
= control target key end

     0   :  { %6 = vsyncpa [#allocation3], 0  ;;  %s2354_s0 = inlined_call_operand.hbm [shape: f32[2,4,256], index: 0, kind: input, shape index: {}]   ;;  %s2355_s1 = inlined_call_operand.hbm [shape: f32[2,16,64], index: 1, kind: output, shape index: {}]  }
   0x1   :  { %8 = vsyncpa [#allocation3 + $0x1], 0 }
   0x2   :  { %9 = vsyncpa [#allocation4], 0 }
   0x3   :  { %11 = vsyncpa [#allocation4 + $0x1], 0  ;;  %s2049_s6 = smov 0   ;;  %s2051_s7 = smov 0  }
   0x4   :  { %s2053_s8 = smov 0   ;;  %s2055_s9 = smov 0  }
   0x5   :  { %s2057_s10 = smov 0   ;;  %s2059_s11 = smov 0  }
   0x6   :  { %s2061_s12 = smov 0   ;;  %s2063_s13 = smov 0  }
   0x7 LB: > { %s1754_s14 = sadd.s32 4294967295, %s2013_s13   ;;  %s1755_s15 = sadd.s32 4294967294, %s2013_s13   ;;  %s2013_s13 = sphi %s2063_s13, %s17_s13   ;;  %s2009_s12 = sphi %s2061_s12, %s2372_s12   ;;  %s2005_s11 = sphi %s2059_s11, %s2371_s11   ;;  %s2001_s10 = sphi %s2057_s10, %s2370_s10   ;;  %s1997_s9 = sphi %s2055_s9, %s2369_s9   ;;  %s1993_s8 = sphi %s2053_s8, %s2368_s8   ;;  %s1989_s7 = sphi %s2051_s7, %s2367_s7   ;;  %s1985_s6 = sphi %s2049_s6, %s2366_s6  }
   0x8   : > { %s26_s16 = sadd.s32 1, %s2005_s11  ;;  %s29_s17 = sadd.s32 1, %s2009_s12 }
   0x9   : > { %p27_p0 = scmp.ge.s32.totalorder %s26_s16, 2  ;;  %s38_s18 = sadd.s32 1, %s1993_s8 }
   0xa   : > { %p45_p1 = scmp.ne.s32.totalorder %s1993_s8, %s1989_s7  ;;  %p46_p2 = scmp.eq.s32.totalorder %s2013_s13, 0 }
   0xb   : > { %s2374_s16 = smov (%p27_p0, %s26_s16), 0  ;;  %s2376_s17 = smov (!%p27_p0, %s29_s17), %s2009_s12 }
   0xc   : > { %s34_s19 = ssub.s32 %s2005_s11, %s2374_s16  ;;  %p2102_p3 = por %p46_p2, %p45_p1 }
   0xd   : > { %p31_p4 = scmp.ge.s32.totalorder %s2376_s17, 2  ;;  %p51_p5 = scmp.ne.s32.totalorder %s1989_s7, %s1985_s6 }
   0xe   : > { %p52_p6 = scmp.eq.s32.totalorder %s1754_s14, 0  ;;  %p77_p7 = scmp.eq.s32.totalorder %s1754_s14, 3 }
   0xf   : > { %s2378_s17 = smov (%p31_p4, %s2376_s17), 0  ;;  %p83_p10 = scmp.eq.s32.totalorder %s1755_s15, 3 }
  0x10   : > { %p2110_p8 = por %p52_p6, %p51_p5  ;;  %p2114_p9 = por %p77_p7, %p45_p1 }
  0x11   : > { %s33_s23 = ssub.s32 %s2009_s12, %s2378_s17  ;;  %p2120_p12 = por %p83_p10, %p51_p5 }
  0x12   : > { %s2359_s22 = scalar_select %p2114_p9, 1, 0 }
  0x13   : > { %s35_s24 = sor.u32 %s34_s19, %s33_s23  ;;  %p1797_p13 = scmp.lt.s32.totalorder %s2013_s13, 4 }
  0x14   : > { %p36_p11 = scmp.eq.s32.totalorder %s35_s24, 0  ;;  %s103_s26 = sand.u32 1, %s1993_s8  }
  0x15   : > { %s2360_s25 = scalar_select %p2120_p12, 1, 0 }
  0x16   : > { %s2127_s27 = scalar_select %p36_p11, %s1993_s8, %s38_s18  }
  0x17   : > { %s1758_s28 = sshll.u32 %s103_s26, 2  ;;  %s1759_s29 = sshll.u32 %s2009_s12, 1 }
  0x18   : > { %s112_s30 = sadd.s32 %s2005_s11, %s1759_s29  ;;  %s107_s2 = scalar_lea.vmem [#allocation2], %s1758_s28 }
  0x19   : > { %s116_s3 = sshll.u32 %s107_s2, 4  ;;  %s1760_s4 = sshll.u32 %s112_s30, 6  ;;  %s2131_s3 = int_to_ptr.vmem [resolvable:$true] %s116_s3 }
  0x1a   : > { %s2136_s15 = scalar_lea.hbm %s2354_s0, %s1760_s4  ;;  %p2140_p0 = pnand %p1797_p13, %p2102_p3 }
  0x1b   : > { %s104_s19 = scalar_lea.sflag [#allocation3], %s103_s26  ;;  %s1885_s23 = scalar_lea.hbm %s2136_s15, 64 }
  0x1c   : > { %p1886_p4 = scmp.ne.s32.totalorder %s2136_s15, %s1885_s23  ;;  %p1887_p5 = pneg %p2140_p0 }
  0x1d   : > { %s1890_s28 = scalar_lea.hbm %s2354_s0, 256  ;;  %p1891_p3 = scmp.lt.u32.totalorder %s2136_s15, %s2354_s0 }
  0x1e   : > { %p1888_p6 = pnand %p1887_p5, %p1886_p4  ;;  %p1892_p10 = scmp.lt.u32.totalorder %s1890_s28, %s1885_s23 }
  0x1f   : > { %p1894_p13 = scmp.lt.u32.totalorder %s1885_s23, %s2136_s15 }
  0x20   : > { %p1889_p7 = pneg %p1888_p6  ;;  %p1893_p11 = por %p1892_p10, %p1891_p3 }
  0x22   : > { %p1895_p1 = por %p1894_p13, %p1893_p11 }
  0x24   : > { %p1896_p2 = pnand %p1895_p1, %p1889_p7 }
  0x26   : > { %1899 = shalt.err (!%p1896_p2)
}
  0x27   : > { %s1900_s26 = scalar_lea.vmem %s2131_s3, 64  ;;  %s2015_s2 = smov [#allocation2]  }
  0x28   : > { %p1901_p4 = scmp.ne.s32.totalorder %s2131_s3, %s1900_s26  ;;  %s1905_s4 = sshll.u32 %s2015_s2, 4  ;;  %s1906_s4 = int_to_ptr.vmem [resolvable:$false] %s1905_s4 }
  0x29   : > { %s1907_s5 = scalar_lea.vmem %s1906_s4, 128  ;;  %p1908_p9 = scmp.lt.s32.totalorder %s2131_s3, %s1906_s4 }
  0x2a   : > { %p1903_p6 = pnand %p1901_p4, %p1887_p5  ;;  %p1909_p3 = scmp.lt.s32.totalorder %s1907_s5, %s1900_s26 }
  0x2c   : > { %p1904_p12 = pneg %p1903_p6  ;;  %p1910_p10 = por %p1909_p3, %p1908_p9 }
  0x2e   : > { %p1911_p11 = pnand %p1910_p10, %p1904_p12 }
  0x30   : > { %1914 = shalt.err (!%p1911_p11)
}
  0x31   : > { %1792 = dma.hbm_to_vmem [thread:$0]  (!%p2140_p0), %s2136_s15, 64, %s2131_s3, %s104_s19  }
  0x32   : > { %p2362_p1 = scmp.lt.s32.totalorder %s2013_s13, 5  ;;  %p2363_p2 = scmp.ge.s32.totalorder %s2013_s13, 1 }
  0x34   : > { %p122_p5 = pnand %p2363_p2, %p2362_p1 }
  0x35   : > { %s2176_s14 = sand.u32 (!%p122_p5), 1, %s1989_s7  }
  0x36   : > { %125 = sbr.rel (%p122_p5) target bundleno = 675 (0x2a3), region = 24  ;;  %s1762_s23 = sshll.u32 (!%p122_p5), %s2176_s14, 2 }
  0x37   : > { %s128_s20 = scalar_lea.sflag (!%p122_p5), [#allocation3], %s2176_s14  ;;  %s131_s24 = scalar_lea.vmem (!%p122_p5), [#allocation2], %s1762_s23 }
  0x3d   : > { %1976 = dma.done.wait (%p2110_p8), %s128_s20, 64  }
  0x3e   : > { %1978 = vsyncadd (%p2110_p8), %s128_s20, 4294967232  ;;  %v150_v0 = vld [vmem:[%s131_s24] sm:$0xf]  ;;  %s2016_s3 = smov 80   ;;  %s2017_s15 = smov 112   ;;  %v177_v5 = vlaneseq  ;;  %v2025_v58 = vmov 0.0  }
  0x3f   : > { %158 = vrot.lane.b32.xlu1 %v150_v0, %s2016_s3  ;;  %152 = vrot.lane.b32.xlu0 %v150_v0, %s2017_s15  ;;  %s2018_s18 = smov 64   ;;  %s2019_s19 = smov 96   ;;  %v2023_v3 = vmov 1983009808   ;;  %v2024_v11 = vmov 1934713408  }
  0x40   : > { %s2020_s28 = smov 32   ;;  %s2021_s29 = smov 48   ;;  %v175_v4 = vunpack.c.l.s4 %v2023_v3  ;;  %v178_v9 = vshrl.u32 %v177_v5, 7  ;;  %v208_v12 = vunpack.c.l.s4 %v2024_v11  ;;  %vm1621_vm0 = vcmask 31744  }
  0x41   : > { %s2022_s30 = smov 16   ;;  %s2026_s21 = smov 8   ;;  %vm1623_vm1 = vcmask 64512   ;;  %vm1625_vm2 = vcmask 97280   ;;  %vm1627_vm3 = vcmask 130048   ;;  %vm1629_vm4 = vcmask 162816  }
  0x42   : > { %v176_v8 = vunpack.c.0.s8 %v175_v4  ;;  %v209_v19 = vunpack.c.0.s8 %v208_v12  ;;  %s2027_s26 = smov 4   ;;  %s2028_s2 = smov 12   ;;  %vm1631_vm5 = vcmask 195584   ;;  %vm1633_vm6 = vcmask 228352  }
  0x43   : > { %161 = vrot.lane.b32.xlu1 %v150_v0, %s2018_s18  ;;  %155 = vrot.lane.b32.xlu0 %v150_v0, %s2019_s19  ;;  %s2029_s4 = smov 28   ;;  %s2030_s5 = smov 20   ;;  %vm1635_vm7 = vcmask 261120   ;;  %vm1637_vm8 = vcmask 293888   ;;  %vm1639_vm9 = vcmask 326656   ;;  %vm1641_vm10 = vcmask 359424  }
  0x44   : > { %v2187_v15 = vsub.s32 %v176_v8, %v178_v9  ;;  %v2193_v26 = vsub.s32 %v209_v19, %v178_v9  ;;  %s2031_s23 = smov 36   ;;  %s2032_s20 = smov 24   ;;  %vm1643_vm11 = vcmask 392192   ;;  %vm1645_vm12 = vcmask 424960  }
  0x45   : > { %s2033_s24 = smov 44   ;;  %s2034_s3 = smov 52   ;;  %vm1647_vm13 = vcmask 457728   ;;  %vm1649_vm14 = vcmask 490496   ;;  %vm1651_vm15 = vcmask 523264  }
  0x46   : > { %s2035_s15 = smov 40   ;;  %s2036_s18 = smov 60  }
  0x47   : > { %167 = vrot.lane.b32.xlu1 %v150_v0, %s2020_s28  ;;  %164 = vrot.lane.b32.xlu0 %v150_v0, %s2021_s29  ;;  %s2037_s19 = smov 56   ;;  %p2364_p9 = scmp.ne.s32.totalorder %s2359_s22, 0 }
  0x4b   : > { %170 = vrot.lane.b32.xlu0 %v150_v0, %s2022_s30 }
  0xb1   : > { %v159_v1 = vpop.permute.xlu1 %158  ;;  %v153_v2 = vpop.permute.xlu0 %152 }
  0xb2   : > { %v181_v16 = vcombine.low %v153_v2, %v159_v1 }
  0xb4   : > { %v188_v21 = vrot.slane %v181_v16, %v2187_v15 }
  0xb5   : > { %v162_v6 = vpop.permute.xlu1 %161  ;;  %v156_v7 = vpop.permute.xlu0 %155 }
  0xb6   : > { %v173_v10 = vcombine.low %v150_v0, %v156_v7 }
  0xb8   : > { %v180_v17 = vrot.slane %v173_v10, %v2187_v15 }
  0xb9   : > { %v168_v13 = vpop.permute.xlu1 %167  ;;  %v165_v14 = vpop.permute.xlu0 %164 }
  0xba   : > { %v189_v18 = vcombine.low %v162_v6, %v168_v13  ;;  %v205_v23 = vcombine.low %v180_v17, %v188_v21  ;;  %v206_v31 = vcombine.high %v180_v17, %v188_v21 }
  0xbc   : > { %v196_v24 = vrot.slane %v189_v18, %v2187_v15  ;;  %v213_v29 = vrot.slane %v205_v23, %v2193_v26  ;;  %v220_v35 = vrot.slane %v206_v31, %v2193_v26 }
  0xbd   : > { %v171_v20 = vpop.permute.xlu0 %170 }
  0xbe   : > { %v197_v22 = vcombine.low %v165_v14, %v171_v20 }
  0xc0   : > { %v204_v25 = vrot.slane %v197_v22, %v2187_v15 }
  0xc2   : > { %v221_v27 = vcombine.low %v196_v24, %v204_v25  ;;  %v222_v28 = vcombine.high %v196_v24, %v204_v25 }
  0xc4   : > { %v229_v30 = vrot.slane %v221_v27, %v2193_v26  ;;  %v236_v34 = vrot.slane %v222_v28, %v2193_v26 }
  0xc6   : > { %v238_v32 = vcombine.high %v213_v29, %v229_v30  ;;  %v237_v33 = vcombine.low %v213_v29, %v229_v30  ;;  %v239_v36 = vcombine.low %v220_v35, %v236_v34  ;;  %v240_v37 = vcombine.high %v220_v35, %v236_v34 }
  0xc8   : > { %273 = vxpose.xlu0.b32.start.end [1/1] (short) (narrow) %v238_v32, 16  ;;  %241 = vxpose.xlu1.b32.start.end [1/1] (short) (narrow) %v237_v33, 16 }
  0xcd   : > { %305 = vxpose.xlu0.b32.start.end [1/1] (short) (narrow) %v239_v36, 16 }
  0xd2   : > { %337 = vxpose.xlu0.b32.start.end [1/1] (short) (narrow) %v240_v37, 16 }
 0x148   : > { %v289_v38 = vpop.trf.xlu0  ;;  %v257_v41 = vpop.trf.xlu1 }
 0x14c   : > { %v290_v39 = vpop.trf.xlu0  ;;  %v258_v56 = vpop.trf.xlu1 }
 0x150   : > { %v321_v40 = vpop.trf.xlu0 }
 0x151   : > { %v369_v43 = vcombine.low %v257_v41, %v321_v40  ;;  %v370_v47 = vcombine.high %v257_v41, %v321_v40 }
 0x153   : > { %v377_v48 = vrot.slane %v369_v43, %v2187_v15  ;;  %v384_v54 = vrot.slane %v370_v47, %v2187_v15 }
 0x154   : > { %v322_v42 = vpop.trf.xlu0 }
 0x155   : > { %v437_v62 = vcombine.low %v258_v56, %v322_v42  ;;  %v438_v8 = vcombine.high %v258_v56, %v322_v42 }
 0x157   : > { %v445_v3 = vrot.slane %v437_v62, %v2187_v15  ;;  %v452_v13 = vrot.slane %v438_v8, %v2187_v15 }
 0x158   : > { %v353_v44 = vpop.trf.xlu0 }
 0x159   : > { %v385_v45 = vcombine.low %v289_v38, %v353_v44  ;;  %v386_v46 = vcombine.high %v289_v38, %v353_v44 }
 0x15b   : > { %v393_v49 = vrot.slane %v385_v45, %v2187_v15  ;;  %v400_v50 = vrot.slane %v386_v46, %v2187_v15 }
 0x15c   : > { %v354_v53 = vpop.trf.xlu0 }
 0x15d   : > { %v401_v51 = vcombine.low %v377_v48, %v393_v49  ;;  %v402_v52 = vcombine.high %v377_v48, %v393_v49  ;;  %v453_v57 = vcombine.low %v290_v39, %v354_v53  ;;  %v417_v61 = vcombine.low %v384_v54, %v400_v50 }
 0x15e   : > { %v418_v2 = vcombine.high %v384_v54, %v400_v50  ;;  %v454_v4 = vcombine.high %v290_v39, %v354_v53 }
 0x15f   : > { %v409_v55 = vrot.slane %v401_v51, %v2193_v26  ;;  %v416_v60 = vrot.slane %v402_v52, %v2193_v26  ;;  %v461_v63 = vrot.slane %v453_v57, %v2187_v15  ;;  %v425_v1 = vrot.slane %v417_v61, %v2193_v26 }
 0x160   : > { %v432_v6 = vrot.slane %v418_v2, %v2193_v26  ;;  %v468_v9 = vrot.slane %v454_v4, %v2187_v15 }
 0x161   : > { %505 = vxpose.xlu1.b32.start.end [1/1] (short) (narrow) %v409_v55, 8  ;;  %v433_v59 = vcombine.high %v409_v55, %v2025_v58  ;;  %v434_v0 = vcombine.high %v416_v60, %v2025_v58  ;;  %v435_v5 = vcombine.high %v425_v1, %v2025_v58  ;;  %v469_v7 = vcombine.low %v445_v3, %v461_v63 }
 0x162   : > { %v436_v10 = vcombine.high %v432_v6, %v2025_v58  ;;  %v470_v12 = vcombine.high %v445_v3, %v461_v63  ;;  %v485_v17 = vcombine.low %v452_v13, %v468_v9  ;;  %v486_v20 = vcombine.high %v452_v13, %v468_v9 }
 0x163   : > { %537 = vxpose.xlu0.b32.start.end [1/1] (short) (narrow) %v433_v59, 8  ;;  %v477_v11 = vrot.slane %v469_v7, %v2193_v26 }
 0x164   : > { %v484_v16 = vrot.slane %v470_v12, %v2193_v26  ;;  %v493_v19 = vrot.slane %v485_v17, %v2193_v26  ;;  %v500_v22 = vrot.slane %v486_v20, %v2193_v26 }
 0x165   : > { %569 = vxpose.xlu1.b32.start.end [1/1] (short) (narrow) %v416_v60, 8  ;;  %v501_v14 = vcombine.high %v477_v11, %v2025_v58 }
 0x166   : > { %v502_v18 = vcombine.high %v484_v16, %v2025_v58  ;;  %v503_v21 = vcombine.high %v493_v19, %v2025_v58  ;;  %v504_v23 = vcombine.high %v500_v22, %v2025_v58 }
 0x167   : > { %601 = vxpose.xlu0.b32.start.end [1/1] (short) (narrow) %v434_v0, 8 }
 0x169   : > { %633 = vxpose.xlu1.b32.start.end [1/1] (short) (narrow) %v425_v1, 8 }
 0x16b   : > { %665 = vxpose.xlu0.b32.start.end [1/1] (short) (narrow) %v435_v5, 8 }
 0x16d   : > { %697 = vxpose.xlu1.b32.start.end [1/1] (short) (narrow) %v432_v6, 8 }
 0x16f   : > { %729 = vxpose.xlu0.b32.start.end [1/1] (short) (narrow) %v436_v10, 8 }
 0x171   : > { %761 = vxpose.xlu1.b32.start.end [1/1] (short) (narrow) %v477_v11, 8 }
 0x173   : > { %793 = vxpose.xlu0.b32.start.end [1/1] (short) (narrow) %v501_v14, 8 }
 0x175   : > { %825 = vxpose.xlu1.b32.start.end [1/1] (short) (narrow) %v484_v16, 8 }
 0x177   : > { %857 = vxpose.xlu0.b32.start.end [1/1] (short) (narrow) %v502_v18, 8 }
 0x179   : > { %889 = vxpose.xlu1.b32.start.end [1/1] (short) (narrow) %v493_v19, 8 }
 0x17b   : > { %921 = vxpose.xlu0.b32.start.end [1/1] (short) (narrow) %v503_v21, 8 }
 0x17d   : > { %953 = vxpose.xlu1.b32.start.end [1/1] (short) (narrow) %v500_v22, 8 }
 0x17f   : > { %985 = vxpose.xlu0.b32.start.end [1/1] (short) (narrow) %v504_v23, 8 }
 0x1e1   : > { %v521_v24 = vpop.trf.xlu1 }
 0x1e3   : > { %v553_v25 = vpop.trf.xlu0 }
 0x1e5   : > { %v585_v27 = vpop.trf.xlu1 }
 0x1e6   : > { %v1017_v28 = vcombine.low %v521_v24, %v585_v27  ;;  %v1018_v29 = vcombine.high %v521_v24, %v585_v27 }
 0x1e7   : > { %v617_v30 = vpop.trf.xlu0 }
 0x1e8   : > { %v1033_v31 = vcombine.low %v553_v25, %v617_v30  ;;  %v1034_v32 = vcombine.high %v553_v25, %v617_v30  ;;  %v1025_v34 = vrot.slane %v1017_v28, %v2187_v15  ;;  %v1032_v35 = vrot.slane %v1018_v29, %v2187_v15 }
 0x1e9   : > { %v649_v33 = vpop.trf.xlu1 }
 0x1ea   : > { %v1041_v36 = vrot.slane %v1033_v31, %v2187_v15  ;;  %v1048_v37 = vrot.slane %v1034_v32, %v2187_v15 }
 0x1eb   : > { %v681_v38 = vpop.trf.xlu0 }
 0x1ec   : > { %v1081_v39 = vcombine.low %v1025_v34, %v1041_v36  ;;  %v1082_v40 = vcombine.high %v1025_v34, %v1041_v36  ;;  %v1097_v41 = vcombine.low %v1032_v35, %v1048_v37  ;;  %v1098_v42 = vcombine.high %v1032_v35, %v1048_v37 }
 0x1ed   : > { %v713_v43 = vpop.trf.xlu1 }
 0x1ee   : > { %v1089_v44 = vrot.slane %v1081_v39, %v2193_v26  ;;  %v1096_v45 = vrot.slane %v1082_v40, %v2193_v26  ;;  %v1105_v46 = vrot.slane %v1097_v41, %v2193_v26  ;;  %v1112_v47 = vrot.slane %v1098_v42, %v2193_v26 }
 0x1ef   : > { %v1049_v48 = vcombine.low %v649_v33, %v713_v43  ;;  %v1050_v49 = vcombine.high %v649_v33, %v713_v43  ;;  %v745_v50 = vpop.trf.xlu0 }
 0x1f0   : > { %v1764_v51 = vcombine.low %v1089_v44, %v1096_v45  ;;  %v1766_v52 = vcombine.high %v1089_v44, %v1096_v45  ;;  %v1768_v53 = vcombine.low %v1105_v46, %v1112_v47  ;;  %v1770_v54 = vcombine.high %v1105_v46, %v1112_v47 }
 0x1f1   : > { %v1065_v55 = vcombine.low %v681_v38, %v745_v50  ;;  %v1066_v56 = vcombine.high %v681_v38, %v745_v50  ;;  %v777_v57 = vpop.trf.xlu1  ;;  %v1057_v62 = vrot.slane %v1049_v48, %v2187_v15  ;;  %v1064_v63 = vrot.slane %v1050_v49, %v2187_v15 }
 0x1f2   : > { %v1297_v58 = vrot.slane %v1764_v51, %v2187_v15  ;;  %v1313_v59 = vrot.slane %v1766_v52, %v2187_v15  ;;  %v1329_v60 = vrot.slane %v1768_v53, %v2187_v15  ;;  %v1345_v61 = vrot.slane %v1770_v54, %v2187_v15 }
 0x1f3   : > { %v1073_v0 = vrot.slane %v1065_v55, %v2187_v15  ;;  %v1080_v1 = vrot.slane %v1066_v56, %v2187_v15  ;;  %v809_v2 = vpop.trf.xlu0 }
 0x1f4   : > { %v1354_v3 = vcombine.high %v1297_v58, %v1313_v59  ;;  %v1386_v4 = vcombine.high %v1329_v60, %v1345_v61  ;;  %v1353_v5 = vcombine.low %v1297_v58, %v1313_v59  ;;  %v1385_v6 = vcombine.low %v1329_v60, %v1345_v61 }
 0x1f5   : > { %v1113_v7 = vcombine.low %v1057_v62, %v1073_v0  ;;  %v1114_v8 = vcombine.high %v1057_v62, %v1073_v0  ;;  %v1129_v9 = vcombine.low %v1064_v63, %v1080_v1  ;;  %v1130_v10 = vcombine.high %v1064_v63, %v1080_v1  ;;  %v841_v11 = vpop.trf.xlu1 }
 0x1f6   : > { %v1153_v12 = vcombine.low %v777_v57, %v841_v11  ;;  %v1154_v13 = vcombine.high %v777_v57, %v841_v11  ;;  %v1368_v14 = vrot.slane %v1354_v3, %v2193_v26  ;;  %v1400_v16 = vrot.slane %v1386_v4, %v2193_v26 }
 0x1f7   : > { %v1121_v17 = vrot.slane %v1113_v7, %v2193_v26  ;;  %v1128_v18 = vrot.slane %v1114_v8, %v2193_v26  ;;  %v1137_v19 = vrot.slane %v1129_v9, %v2193_v26  ;;  %v1144_v20 = vrot.slane %v1130_v10, %v2193_v26  ;;  %v873_v21 = vpop.trf.xlu0 }
 0x1f8   : > { %v1169_v22 = vcombine.low %v809_v2, %v873_v21  ;;  %v1170_v23 = vcombine.high %v809_v2, %v873_v21  ;;  %v1161_v24 = vrot.slane %v1153_v12, %v2187_v15  ;;  %v1168_v25 = vrot.slane %v1154_v13, %v2187_v15 }
 0x1f9   : > { %v1765_v27 = vcombine.low %v1121_v17, %v1128_v18  ;;  %v1767_v28 = vcombine.high %v1121_v17, %v1128_v18  ;;  %v1769_v29 = vcombine.low %v1137_v19, %v1144_v20  ;;  %v1771_v30 = vcombine.high %v1137_v19, %v1144_v20  ;;  %v905_v31 = vpop.trf.xlu1 }
 0x1fa   : > { %v1177_v32 = vrot.slane %v1169_v22, %v2187_v15  ;;  %v1184_v33 = vrot.slane %v1170_v23, %v2187_v15  ;;  %v1419_v34 = vcombine.low %v1368_v14, %v1400_v16  ;;  %v2242_v35 = vrot.slane %v1353_v5, %v2193_v26 }
 0x1fb   : > { %v2245_v36 = vrot.slane %v1385_v6, %v2193_v26  ;;  %v937_v37 = vpop.trf.xlu0  ;;  %v1420_v38 = vcombine.high %v1368_v14, %v1400_v16  ;;  %v1304_v39 = vrot.slane %v1765_v27, %v2187_v15  ;;  %v1320_v40 = vrot.slane %v1767_v28, %v2187_v15 }
 0x1fc   : > { %v1217_v41 = vcombine.low %v1161_v24, %v1177_v32  ;;  %v1218_v42 = vcombine.high %v1161_v24, %v1177_v32  ;;  %v1233_v43 = vcombine.low %v1168_v25, %v1184_v33  ;;  %v1234_v44 = vcombine.high %v1168_v25, %v1184_v33  ;;  %1566 = vrot.lane.b32.xlu0 %v1419_v34, %s2026_s21 }
 0x1fd   : > { %v1418_v45 = vcombine.high %v2242_v35, %v2245_v36  ;;  %v969_v46 = vpop.trf.xlu1  ;;  %v1336_v47 = vrot.slane %v1769_v29, %v2187_v15  ;;  %v1352_v48 = vrot.slane %v1771_v30, %v2187_v15  ;;  %v1370_v49 = vcombine.high %v1304_v39, %v1320_v40 }
 0x1fe   : > { %v1225_v50 = vrot.slane %v1217_v41, %v2193_v26  ;;  %v1232_v51 = vrot.slane %v1218_v42, %v2193_v26  ;;  %v1241_v52 = vrot.slane %v1233_v43, %v2193_v26  ;;  %v1248_v53 = vrot.slane %v1234_v44, %v2193_v26 }
 0x1ff   : > { %1562 = vrot.lane.b32.xlu1 %v1418_v45, %s2027_s26  ;;  %v1001_v54 = vpop.trf.xlu0  ;;  %v1185_v55 = vcombine.low %v905_v31, %v969_v46  ;;  %v1186_v56 = vcombine.high %v905_v31, %v969_v46  ;;  %v2258_v57 = vrot.slane %v1370_v49, %v2193_v26  ;;  %v1402_v58 = vcombine.high %v1336_v47, %v1352_v48 }
 0x200   : > { %v1772_v59 = vcombine.low %v1225_v50, %v1232_v51  ;;  %v1774_v60 = vcombine.high %v1225_v50, %v1232_v51  ;;  %v1776_v61 = vcombine.low %v1241_v52, %v1248_v53  ;;  %v1778_v62 = vcombine.high %v1241_v52, %v1248_v53 }
 0x201   : > { %v1201_v63 = vcombine.low %v937_v37, %v1001_v54  ;;  %v1202_v0 = vcombine.high %v937_v37, %v1001_v54  ;;  %v1193_v1 = vrot.slane %v1185_v55, %v2187_v15  ;;  %v1200_v2 = vrot.slane %v1186_v56, %v2187_v15 }
 0x202   : > { %v1416_v3 = vrot.slane %v1402_v58, %v2193_v26  ;;  %v1369_v4 = vcombine.low %v1304_v39, %v1320_v40  ;;  %v1401_v5 = vcombine.low %v1336_v47, %v1352_v48  ;;  %v1433_v6 = vrot.slane %v1772_v59, %v2187_v15 }
 0x203   : > { %1570 = vrot.lane.b32.xlu1 %v1420_v38, %s2028_s2  ;;  %v1209_v7 = vrot.slane %v1201_v63, %v2187_v15  ;;  %v1216_v8 = vrot.slane %v1202_v0, %v2187_v15  ;;  %v1449_v9 = vrot.slane %v1774_v60, %v2187_v15  ;;  %v1465_v13 = vrot.slane %v1776_v61, %v2187_v15 }
 0x204   : > { %v1424_v10 = vcombine.high %v2258_v57, %v1416_v3  ;;  %v1377_v11 = vrot.slane %v1369_v4, %v2193_v26  ;;  %v1409_v12 = vrot.slane %v1401_v5, %v2193_v26  ;;  %v1481_v20 = vrot.slane %v1778_v62, %v2187_v15 }
 0x205   : > { %v1249_v14 = vcombine.low %v1193_v1, %v1209_v7  ;;  %v1250_v16 = vcombine.high %v1193_v1, %v1209_v7  ;;  %v1265_v17 = vcombine.low %v1200_v2, %v1216_v8  ;;  %v1266_v18 = vcombine.high %v1200_v2, %v1216_v8 }
 0x206   : > { %1586 = vrot.lane.b32.xlu0 %v1424_v10, %s2029_s4  ;;  %v1421_v19 = vcombine.low %v1377_v11, %v1409_v12  ;;  %v1489_v21 = vcombine.low %v1433_v6, %v1449_v9  ;;  %v1521_v28 = vcombine.low %v1465_v13, %v1481_v20  ;;  %v1490_v29 = vcombine.high %v1433_v6, %v1449_v9 }
 0x207   : > { %v1257_v22 = vrot.slane %v1249_v14, %v2193_v26  ;;  %v1264_v23 = vrot.slane %v1250_v16, %v2193_v26  ;;  %v1273_v24 = vrot.slane %v1265_v17, %v2193_v26  ;;  %v1280_v25 = vrot.slane %v1266_v18, %v2193_v26 }
 0x208   : > { %1574 = vrot.lane.b32.xlu1 %v1421_v19, %s2022_s30  ;;  %v1497_v27 = vrot.slane %v1489_v21, %v2193_v26  ;;  %v1522_v30 = vcombine.high %v1465_v13, %v1481_v20  ;;  %v1422_v37 = vcombine.high %v1377_v11, %v1409_v12  ;;  %v1529_v38 = vrot.slane %v1521_v28, %v2193_v26 }
 0x209   : > { %v1773_v31 = vcombine.low %v1257_v22, %v1264_v23  ;;  %v1775_v32 = vcombine.high %v1257_v22, %v1264_v23  ;;  %v1777_v33 = vcombine.low %v1273_v24, %v1280_v25  ;;  %v1779_v34 = vcombine.high %v1273_v24, %v1280_v25 }
 0x20a   : > { %v1417_v39 = vcombine.low %v2242_v35, %v2245_v36  ;;  %v1554_v44 = vcombine.high %v1497_v27, %v1529_v38  ;;  %v1504_v45 = vrot.slane %v1490_v29, %v2193_v26  ;;  %v1536_v46 = vrot.slane %v1522_v30, %v2193_v26 }
 0x20b   : > { %v1440_v40 = vrot.slane %v1773_v31, %v2187_v15  ;;  %v1456_v41 = vrot.slane %v1775_v32, %v2187_v15  ;;  %v1472_v42 = vrot.slane %v1777_v33, %v2187_v15  ;;  %v1488_v43 = vrot.slane %v1779_v34, %v2187_v15 }
 0x20c   : > { %1578 = vrot.lane.b32.xlu1 %v1422_v37, %s2030_s5  ;;  %v1423_v49 = vcombine.low %v2258_v57, %v1416_v3  ;;  %1594 = vrot.lane.b32.xlu0 %v1554_v44, %s2031_s23  ;;  %v1556_v15 = vcombine.high %v1504_v45, %v1536_v46  ;;  %v1553_v52 = vcombine.low %v1497_v27, %v1529_v38  ;;  %s1654_s5 = scalar_lea.sflag [#allocation4], %s2176_s14 }
 0x20d   : > { %v1505_v47 = vcombine.low %v1440_v40, %v1456_v41  ;;  %v1537_v48 = vcombine.low %v1472_v42, %v1488_v43  ;;  %v1506_v50 = vcombine.high %v1440_v40, %v1456_v41  ;;  %v1538_v51 = vcombine.high %v1472_v42, %v1488_v43 }
 0x20e   : > { %v1555_v56 = vcombine.low %v1504_v45, %v1536_v46 }
 0x20f   : > { %v1513_v35 = vrot.slane %v1505_v47, %v2193_v26  ;;  %v1545_v36 = vrot.slane %v1537_v48, %v2193_v26  ;;  %v1520_v54 = vrot.slane %v1506_v50, %v2193_v26  ;;  %v1552_v55 = vrot.slane %v1538_v51, %v2193_v26 }
 0x210   : > { %1582 = vrot.lane.b32.xlu1 %v1423_v49, %s2032_s20  ;;  %1602 = vrot.lane.b32.xlu0 %v1556_v15, %s2033_s24  ;;  %s2038_s20 = smov [#allocation5]  }
 0x211   : > { %v1558_v53 = vcombine.high %v1513_v35, %v1545_v36  ;;  %v1560_v57 = vcombine.high %v1520_v54, %v1552_v55  ;;  %v1557_v58 = vcombine.low %v1513_v35, %v1545_v36  ;;  %v1559_v59 = vcombine.low %v1520_v54, %v1552_v55  ;;  %s1919_s24 = sshll.u32 %s2038_s20, 4  ;;  %s1920_s24 = int_to_ptr.vmem [resolvable:$false] %s1919_s24 }
 0x214   : > { %1590 = vrot.lane.b32.xlu1 %v1553_v52, %s2020_s28  ;;  %1610 = vrot.lane.b32.xlu0 %v1558_v53, %s2034_s3  ;;  %s1763_s28 = sshll.u32 %s2176_s14, 3  ;;  %s1921_s3 = scalar_lea.vmem %s1920_s24, 256 }
 0x215   : > { %s149_s26 = scalar_lea.vmem [#allocation5], %s1763_s28 }
 0x216   : > { %s1669_s2 = sshll.u32 %s149_s26, 4  ;;  %s2302_s2 = int_to_ptr.vmem [resolvable:$true] %s1669_s2 }
 0x217   : > { %s1915_s23 = scalar_lea.vmem %s2302_s2, 128  ;;  %p1922_p7 = scmp.lt.s32.totalorder %s2302_s2, %s1920_s24 }
 0x218   : > { %1598 = vrot.lane.b32.xlu1 %v1555_v56, %s2035_s15  ;;  %1618 = vrot.lane.b32.xlu0 %v1560_v57, %s2036_s18  ;;  %p1916_p8 = scmp.ne.s32.totalorder %s2302_s2, %s1915_s23  ;;  %p1923_p13 = scmp.lt.s32.totalorder %s1921_s3, %s1915_s23 }
 0x21a   : > { %p1917_p12 = pnand %p1916_p8, %p2364_p9  ;;  %p1924_p4 = por %p1923_p13, %p1922_p7 }
 0x21c   : > { %1606 = vrot.lane.b32.xlu1 %v1557_v58, %s2021_s29  ;;  %s1781_s29 = sshll.u32 %s2001_s10, 1  ;;  %p1918_p0 = pneg %p1917_p12 }
 0x21d   : > { %s1665_s30 = sadd.s32 %s1997_s9, %s1781_s29 }
 0x21e   : > { %s1782_s21 = sshll.u32 %s1665_s30, 7  ;;  %p1925_p6 = pnand %p1924_p4, %p1918_p0 }
 0x21f   : > { %s2300_s9 = scalar_lea.hbm %s2355_s1, %s1782_s21 }
 0x220   : > { %1614 = vrot.lane.b32.xlu1 %v1559_v59, %s2037_s19 }
 0x26e   : > { %v1567_v62 = vpop.permute.xlu0 %1566 }
 0x271   : > { %v1563_v60 = vpop.permute.xlu1 %1562 }
 0x272   : > { %v1622_v26 = vsel %vm1621_vm0, %v1417_v39, %v1563_v60 }
 0x273   : > { %v1624_v2 = vsel %vm1623_vm1, %v1622_v26, %v1567_v62 }
 0x275   : > { %v1571_v61 = vpop.permute.xlu1 %1570 }
 0x276   : > { %v1626_v3 = vsel %vm1625_vm2, %v1624_v2, %v1571_v61 }
 0x278   : > { %v1587_v0 = vpop.permute.xlu0 %1586 }
 0x27a   : > { %v1575_v63 = vpop.permute.xlu1 %1574 }
 0x27b   : > { %v1628_v4 = vsel %vm1627_vm3, %v1626_v3, %v1575_v63 }
 0x27e   : > { %v1579_v1 = vpop.permute.xlu1 %1578  ;;  %v1595_v5 = vpop.permute.xlu0 %1594 }
 0x27f   : > { %v1630_v6 = vsel %vm1629_vm4, %v1628_v4, %v1579_v1 }
 0x282   : > { %v1583_v7 = vpop.permute.xlu1 %1582  ;;  %v1603_v11 = vpop.permute.xlu0 %1602 }
 0x283   : > { %v1632_v8 = vsel %vm1631_vm5, %v1630_v6, %v1583_v7 }
 0x284   : > { %v1634_v9 = vsel %vm1633_vm6, %v1632_v8, %v1587_v0 }
 0x286   : > { %v1591_v10 = vpop.permute.xlu1 %1590  ;;  %v1611_v17 = vpop.permute.xlu0 %1610 }
 0x287   : > { %v1636_v12 = vsel %vm1635_vm7, %v1634_v9, %v1591_v10 }
 0x288   : > { %v1638_v13 = vsel %vm1637_vm8, %v1636_v12, %v1595_v5 }
 0x28a   : > { %v1599_v14 = vpop.permute.xlu1 %1598  ;;  %v1619_v23 = vpop.permute.xlu0 %1618 }
 0x28b   : > { %v1640_v16 = vsel %vm1639_vm9, %v1638_v13, %v1599_v14 }
 0x28c   : > { %v1642_v18 = vsel %vm1641_vm10, %v1640_v16, %v1603_v11 }
 0x28e   : > { %v1607_v19 = vpop.permute.xlu1 %1606 }
 0x28f   : > { %v1644_v20 = vsel %vm1643_vm11, %v1642_v18, %v1607_v19 }
 0x290   : > { %v1646_v21 = vsel %vm1645_vm12, %v1644_v20, %v1611_v17 }
 0x292   : > { %v1615_v22 = vpop.permute.xlu1 %1614 }
 0x293   : > { %v1648_v24 = vsel %vm1647_vm13, %v1646_v21, %v1615_v22 }
 0x294   : > { %v1650_v25 = vsel %vm1649_vm14, %v1648_v24, %v1619_v23 }
 0x295   : > { %1652 = vst.msk [vmem:[%s149_s26] sm:$0xff] %vm1651_vm15, %v1650_v25 }
 0x296   : > { %1928 = shalt.err (!%p1925_p6)
}
 0x297   : > { %s1929_s14 = scalar_lea.hbm %s2300_s9, 128  ;;  %s1933_s19 = scalar_lea.hbm %s2355_s1, 512 }
 0x298   : > { %p1930_p3 = scmp.ne.s32.totalorder %s2300_s9, %s1929_s14  ;;  %p1934_p1 = scmp.lt.u32.totalorder %s2300_s9, %s2355_s1 }
 0x299   : > { %p1935_p2 = scmp.lt.u32.totalorder %s1933_s19, %s1929_s14  ;;  %p1937_p8 = scmp.lt.u32.totalorder %s1929_s14, %s2300_s9 }
 0x29a   : > { %p1931_p10 = pnand %p1930_p3, %p2364_p9 }
 0x29b   : > { %p1936_p5 = por %p1935_p2, %p1934_p1 }
 0x29c   : > { %p1932_p11 = pneg %p1931_p10 }
 0x29d   : > { %p1938_p12 = por %p1937_p8, %p1936_p5 }
 0x29f   : > { %p1939_p0 = pnand %p1938_p12, %p1932_p11 }
 0x2a1   : > { %1942 = shalt.err (!%p1939_p0)
}
 0x2a2   : > { %1787 = dma.vmem_to_hbm [thread:$0]  (%p2364_p9), %s2302_s2, 128, %s2300_s9, %s1654_s5  }
 0x2a3 PF: > { %p1798_p7 = scmp.ge.s32.totalorder %s2013_s13, 2  ;;  %s1681_s30 = sand.u32 1, %s1985_s6  }
 0x2a4   : > { %p2365_p13 = scmp.ne.s32.totalorder %s2360_s25, 0  ;;  %s1682_s21 = scalar_lea.sflag [#allocation4], %s1681_s30 }
 0x2a6   : > { %p1794_p4 = pnand %p1798_p7, %p2365_p13 }
 0x2a8   : > { %1980 = dma.done.wait (!%p1794_p4), %s1682_s21, 128  }
 0x2a9   : > { %1982 = vsyncadd (!%p1794_p4), %s1682_s21, 4294967168  ;;  %s17_s13 = sadd.s32 1, %s2013_s13   ;;  %s2366_s6 = smov %s1989_s7 }
 0x2aa   : > { %p14_p6 = scmp.ge.s32.totalorder %s17_s13, 6   ;;  %s2367_s7 = smov %s1993_s8 }
 0x2ab   : > { %s2368_s8 = smov %s2127_s27  ;;  %s2369_s9 = smov %s2005_s11 }
 0x2ac   : > { %s2370_s10 = smov %s2009_s12  ;;  %s2371_s11 = smov %s2374_s16 }
 0x2ad   : > { %s2372_s12 = smov %s2378_s17  ;;  %16 = sbr.rel (!%p14_p6) target bundleno = 7 (0x7), region = 69 }
 0x2b4   :  { %1687 = vsyncpa [#allocation3], 1 }
 0x2b5   :  { %1689 = vsyncpa [#allocation3 + $0x1], 1 }
 0x2b6   :  { %1690 = vsyncpa [#allocation4], 1 }
 0x2b7   :  { %1692 = vsyncpa [#allocation4 + $0x1], 1 }

</bundles_post_ra>
